<compile_context>
chip_gen: v7x
topology: tpu7x:2x2x1
jax: 0.10.0
libtpu: 0.0.40
codegen_flags: <defaults>
</compile_context>

<pallas_src>
import jax
import jax.numpy as jnp
from jax.experimental import pallas as pl
from jax.experimental.pallas import tpu as pltpu


def mlp_kernel(x_ref, w1_ref, b1_ref, w2_ref, b2_ref, out_ref):
    # hidden = relu(x @ W1 + b1)  -- bf16 MXU inputs, f32 accumulation + epilogue
    x_bf16 = x_ref[...].astype(jnp.bfloat16)
    h = jnp.dot(x_bf16, w1_ref[...], preferred_element_type=jnp.float32)
    h = jnp.maximum(h + b1_ref[...], 0.0)          # b1 is (1, H) f32 -> broadcasts
    # out = sigmoid(h @ W2 + b2)
    o = jnp.dot(h.astype(jnp.bfloat16), w2_ref[...],
                preferred_element_type=jnp.float32)
    o = o + b2_ref[...]
    out_ref[...] = jax.nn.sigmoid(o).astype(out_ref.dtype)


def _round_up(x, m):
    return (x + m - 1) // m * m


def mlp_forward(x, w1, b1, w2, b2, *, lane=128, max_tm=512):
    """x: (B, D_in); w1: (D_in, H); b1: (H,); w2: (H, D_out); b2: (D_out,).

    Weights are stored transposed vs torch nn.Linear: (in_features, out_features),
    so the kernel computes plain x @ W + b.
    """
    B, D_in = x.shape
    H = w1.shape[1]
    D_out = w2.shape[1]

    # Pad feature dims to lane multiples (128) for lane-dense MXU tiles & stores.
    D_in_p = _round_up(D_in, lane)
    H_p = _round_up(H, lane)
    D_out_p = _round_up(D_out, lane)

    # Batch tile: multiple of 8 sublanes, capped so VMEM stays small; pad batch.
    TM = min(max_tm, _round_up(B, 8))
    B_p = _round_up(B, TM)

    # Zero-pad inputs / params.  Zero padding is semantics-preserving here:
    # padded hidden lanes get relu(0 + 0) = 0 and contribute nothing; padded
    # output lanes are sliced off below.
    x_p = jnp.zeros((B_p, D_in_p), x.dtype).at[:B, :D_in].set(x)
    w1_p = jnp.zeros((D_in_p, H_p), jnp.bfloat16).at[:D_in, :H].set(
        w1.astype(jnp.bfloat16))
    b1_p = jnp.zeros((1, H_p), jnp.float32).at[0, :H].set(b1.astype(jnp.float32))
    w2_p = jnp.zeros((H_p, D_out_p), jnp.bfloat16).at[:H, :D_out].set(
        w2.astype(jnp.bfloat16))
    b2_p = jnp.zeros((1, D_out_p), jnp.float32).at[0, :D_out].set(
        b2.astype(jnp.float32))

    # VMEM budget (double-buffered x/out tiles, resident bf16 weights, f32
    # biases, plus the f32 hidden intermediate). Clamp to the 32 MiB scoped
    # default so it is safe on v7x (64 MiB physical VMEM).
    itm = jnp.dtype(x.dtype).itemsize
    vmem_est = (2 * TM * (D_in_p + D_out_p) * itm          # pipelined x / out tiles
                + 2 * 2 * (D_in_p * H_p + H_p * D_out_p)   # bf16 weights (2 bufs)
                + 2 * 4 * (H_p + D_out_p)                  # f32 biases
                + 4 * TM * H_p)                            # f32 hidden intermediate
    vmem_limit = int(min(max(2 * vmem_est, 16 * 2**20), 32 * 2**20))

    out_p = pl.pallas_call(
        mlp_kernel,
        out_shape=jax.ShapeDtypeStruct((B_p, D_out_p), x.dtype),
        grid_spec=pl.GridSpec(
            grid=(B_p // TM,),
            in_specs=[
                pl.BlockSpec((TM, D_in_p), lambda i: (i, 0)),     # x tile moves
                pl.BlockSpec((D_in_p, H_p), lambda i: (0, 0)),    # W1 resident
                pl.BlockSpec((1, H_p), lambda i: (0, 0)),         # b1 resident
                pl.BlockSpec((H_p, D_out_p), lambda i: (0, 0)),   # W2 resident
                pl.BlockSpec((1, D_out_p), lambda i: (0, 0)),     # b2 resident
            ],
            out_specs=pl.BlockSpec((TM, D_out_p), lambda i: (i, 0)),
        ),
        compiler_params=pltpu.CompilerParams(
            dimension_semantics=("parallel",),   # lets v7x shard batch tiles over 2 TCs
            vmem_limit_bytes=vmem_limit,
        ),
    )(x_p, w1_p, b1_p, w2_p, b2_p)

    # Strip padding.
    return out_p[:B, :D_out]


if __name__ == "__main__":
    # Small shapes consistent with MLP(input_size, hidden_size, output_size)
    batch, input_size, hidden_size, output_size = 8, 32, 64, 16

    key = jax.random.PRNGKey(0)
    kx, k1, k2, k3, k4 = jax.random.split(key, 5)

    x = jax.random.normal(kx, (batch, input_size), dtype=jnp.float32)

    # Deterministic parameter init (torch Linear default is U(-1/sqrt(fan_in), 1/sqrt(fan_in)))
    lim1 = 1.0 / jnp.sqrt(input_size)
    lim2 = 1.0 / jnp.sqrt(hidden_size)
    # stored transposed vs torch: (in_features, out_features)
    w1 = jax.random.uniform(k1, (input_size, hidden_size), jnp.float32, -lim1, lim1)
    b1 = jax.random.uniform(k2, (hidden_size,), jnp.float32, -lim1, lim1)
    w2 = jax.random.uniform(k3, (hidden_size, output_size), jnp.float32, -lim2, lim2)
    b2 = jax.random.uniform(k4, (output_size,), jnp.float32, -lim2, lim2)

    out = mlp_forward(x, w1, b1, w2, b2)
    out = jax.block_until_ready(out)

    # Reference check in plain JAX (f32); bf16 matmul inputs loosen the tolerance.
    ref = jax.nn.sigmoid(jnp.maximum(x @ w1 + b1, 0.0) @ w2 + b2)
    assert out.shape == (batch, output_size)
    assert jnp.allclose(out, ref, atol=2e-2, rtol=2e-2)

    print("KERNEL_OK")
</pallas_src>

<mosaic_0001>
module attributes {stable_mosaic.version = 11 : i64} {
  func.func @mlp_kernel(%arg0: i32, %arg1: memref<8x128xf32, #tpu.memory_space<vmem>>, %arg2: memref<128x128xbf16, #tpu.memory_space<vmem>>, %arg3: memref<1x128xf32, #tpu.memory_space<vmem>>, %arg4: memref<128x128xbf16, #tpu.memory_space<vmem>>, %arg5: memref<1x128xf32, #tpu.memory_space<vmem>>, %arg6: memref<8x128xf32, #tpu.memory_space<vmem>>) attributes {dimension_semantics = [#tpu.dimension_semantics<parallel>], iteration_bounds = array<i64: 1>, scalar_prefetch = 0 : i64, scratch_operands = 0 : i64, tpu.core_type = #tpu.core_type<tc>, window_params = [{transform_indices = @transform_0, window_bounds = array<i64: 8, 128>}, {pipeline_mode = #tpu.pipeline_mode<synchronous>, transform_indices = @transform_1, window_bounds = array<i64: 128, 128>}, {pipeline_mode = #tpu.pipeline_mode<synchronous>, transform_indices = @transform_2, window_bounds = array<i64: 1, 128>}, {pipeline_mode = #tpu.pipeline_mode<synchronous>, transform_indices = @transform_3, window_bounds = array<i64: 128, 128>}, {pipeline_mode = #tpu.pipeline_mode<synchronous>, transform_indices = @transform_4, window_bounds = array<i64: 1, 128>}, {transform_indices = @transform_5, window_bounds = array<i64: 8, 128>}]} {
    %c0 = arith.constant 0 : index
    %c0_0 = arith.constant 0 : index
    %0 = vector.load %arg1[%c0, %c0_0] : memref<8x128xf32, #tpu.memory_space<vmem>>, vector<8x128xf32>
    %1 = arith.truncf %0 : vector<8x128xf32> to vector<8x128xbf16>
    %c0_1 = arith.constant 0 : index
    %c0_2 = arith.constant 0 : index
    %2 = vector.load %arg2[%c0_1, %c0_2] : memref<128x128xbf16, #tpu.memory_space<vmem>>, vector<128x128xbf16>
    %cst = arith.constant dense<0.000000e+00> : vector<8x128xf32>
    %3 = tpu.matmul %1, %2, %cst {dimension_numbers = #tpu.dot_dimension_numbers<[1], [0], [0], [1], [0, 0, 1, 1], [], []>} : vector<8x128xbf16>, vector<128x128xbf16>, vector<8x128xf32> -> vector<8x128xf32>
    %c0_3 = arith.constant 0 : index
    %c0_4 = arith.constant 0 : index
    %4 = vector.load %arg3[%c0_3, %c0_4] : memref<1x128xf32, #tpu.memory_space<vmem>>, vector<1x128xf32>
    %5 = vector.broadcast %4 : vector<1x128xf32> to vector<8x128xf32>
    %6 = arith.addf %3, %5 : vector<8x128xf32>
    %cst_5 = arith.constant 0.000000e+00 : f32
    %7 = vector.broadcast %cst_5 : f32 to vector<8x128xf32>
    %8 = arith.maximumf %6, %7 : vector<8x128xf32>
    %9 = arith.truncf %8 : vector<8x128xf32> to vector<8x128xbf16>
    %c0_6 = arith.constant 0 : index
    %c0_7 = arith.constant 0 : index
    %10 = vector.load %arg4[%c0_6, %c0_7] : memref<128x128xbf16, #tpu.memory_space<vmem>>, vector<128x128xbf16>
    %cst_8 = arith.constant dense<0.000000e+00> : vector<8x128xf32>
    %11 = tpu.matmul %9, %10, %cst_8 {dimension_numbers = #tpu.dot_dimension_numbers<[1], [0], [0], [1], [0, 0, 1, 1], [], []>} : vector<8x128xbf16>, vector<128x128xbf16>, vector<8x128xf32> -> vector<8x128xf32>
    %c0_9 = arith.constant 0 : index
    %c0_10 = arith.constant 0 : index
    %12 = vector.load %arg5[%c0_9, %c0_10] : memref<1x128xf32, #tpu.memory_space<vmem>>, vector<1x128xf32>
    %13 = vector.broadcast %12 : vector<1x128xf32> to vector<8x128xf32>
    %14 = arith.addf %11, %13 : vector<8x128xf32>
    %15 = arith.negf %14 : vector<8x128xf32>
    %16 = math.exp %15 : vector<8x128xf32>
    %cst_11 = arith.constant 1.000000e+00 : f32
    %17 = vector.broadcast %cst_11 : f32 to vector<8x128xf32>
    %18 = arith.addf %17, %16 : vector<8x128xf32>
    %19 = arith.divf %17, %18 : vector<8x128xf32>
    %c0_12 = arith.constant 0 : index
    %c0_13 = arith.constant 0 : index
    %20 = vector.load %arg6[%c0_12, %c0_13] : memref<8x128xf32, #tpu.memory_space<vmem>>, vector<8x128xf32>
    tpu.vector_store %arg6[%c0_12, %c0_13], %19 {strides = array<i32>} : memref<8x128xf32, #tpu.memory_space<vmem>>, vector<8x128xf32>,
    return
  }
  func.func @transform_0(%arg0: i32) -> (i32, i32) {
    %c0_i32 = arith.constant 0 : i32
    %c0_i32_0 = arith.constant 0 : i32
    return %arg0, %c0_i32 : i32, i32
  }
  func.func @transform_1(%arg0: i32) -> (i32, i32) {
    %c0_i32 = arith.constant 0 : i32
    %c0_i32_0 = arith.constant 0 : i32
    %c0_i32_1 = arith.constant 0 : i32
    return %c0_i32, %c0_i32_0 : i32, i32
  }
  func.func @transform_2(%arg0: i32) -> (i32, i32) {
    %c0_i32 = arith.constant 0 : i32
    %c0_i32_0 = arith.constant 0 : i32
    %c0_i32_1 = arith.constant 0 : i32
    return %c0_i32, %c0_i32_0 : i32, i32
  }
  func.func @transform_3(%arg0: i32) -> (i32, i32) {
    %c0_i32 = arith.constant 0 : i32
    %c0_i32_0 = arith.constant 0 : i32
    %c0_i32_1 = arith.constant 0 : i32
    return %c0_i32, %c0_i32_0 : i32, i32
  }
  func.func @transform_4(%arg0: i32) -> (i32, i32) {
    %c0_i32 = arith.constant 0 : i32
    %c0_i32_0 = arith.constant 0 : i32
    %c0_i32_1 = arith.constant 0 : i32
    return %c0_i32, %c0_i32_0 : i32, i32
  }
  func.func @transform_5(%arg0: i32) -> (i32, i32) {
    %c0_i32 = arith.constant 0 : i32
    %c0_i32_0 = arith.constant 0 : i32
    return %arg0, %c0_i32 : i32, i32
  }
}

</mosaic_0001>

<bundles_post_ra>
// kernel: tpu_custom_call.1
= control target key start
LH: loop header
LB: loop body
LE: loop exit
PB: predicated region body
PF: predicated region fallthrough
CT: control target
= control target key end

     0   :  { %10 = vsyncpa [#allocation3], 0  ;;  %s607_s0 = inlined_call_operand.hbm [shape: f32[8,128], index: 0, kind: input, shape index: {}]   ;;  %s608_s1 = inlined_call_operand.hbm [shape: bf16[128,128], index: 1, kind: input, shape index: {}]   ;;  %s609_s2 = inlined_call_operand.vmem [shape: f32[1,128], index: 2, kind: input, shape index: {}]   ;;  %s610_s3 = inlined_call_operand.hbm [shape: bf16[128,128], index: 3, kind: input, shape index: {}]   ;;  %s611_s4 = inlined_call_operand.vmem [shape: f32[1,128], index: 4, kind: input, shape index: {}]   ;;  %s612_s5 = inlined_call_operand.hbm [shape: f32[8,128], index: 5, kind: output, shape index: {}]  }
   0x1   :  { %11 = vsyncpa [#allocation6], 0 }
   0x2   :  { %12 = vsyncpa [#allocation4], 0  ;;  %s509_s18 = smov [#allocation5]   ;;  %s415_s22 = scalar_lea.hbm %s608_s1, 1024 }
   0x3   :  { %s28_s19 = sshll.u32 %s509_s18, 4  ;;  %p416_p0 = scmp.ne.s32.totalorder %s608_s1, %s415_s22  ;;  %s29_s19 = int_to_ptr.vmem [resolvable:$true] %s28_s19 }
   0x4   :  { %p419_p1 = scmp.lt.u32.totalorder %s415_s22, %s608_s1 }
   0x6   :  { %p421_p2 = pnand %p419_p1, %p416_p0 }
   0x8   :  { %424 = shalt.err (!%p421_p2)
}
   0x9   :  { %s425_s27 = scalar_lea.vmem %s29_s19, 1024  ;;  %p430_p4 = scmp.lt.s32.totalorder %s29_s19, %s29_s19 }
   0xa   :  { %p426_p3 = scmp.ne.s32.totalorder %s29_s19, %s425_s27  ;;  %p431_p5 = scmp.lt.s32.totalorder %s425_s27, %s425_s27 }
   0xc   :  { %p432_p6 = por %p431_p5, %p430_p4 }
   0xe   :  { %p433_p7 = pnand %p432_p6, %p426_p3 }
  0x10   :  { %436 = shalt.err (!%p433_p7)
}
  0x11   :  { %s510_s28 = smov 64   ;;  %s511_s29 = smov 4  }
  0x12   :  { %34 = dma.hbm_to_vmem [thread:$0]  %s608_s1, 1024, %s29_s19, [#allocation6], %s510_s28, %s510_s28, %s511_s29  }
  0x13   :  { %s512_s7 = smov [#allocation2]   ;;  %s513_s9 = smov [#allocation7]  }
  0x14   :  { %s19_s8 = sshll.u32 %s512_s7, 4  ;;  %s42_s10 = sshll.u32 %s513_s9, 4  ;;  %s20_s8 = int_to_ptr.vmem [resolvable:$true] %s19_s8  ;;  %s43_s10 = int_to_ptr.vmem [resolvable:$true] %s42_s10 }
  0x15   :  { %s437_s13 = scalar_lea.hbm %s607_s0, 128 }
  0x16   :  { %p438_p8 = scmp.ne.s32.totalorder %s607_s0, %s437_s13  ;;  %p441_p9 = scmp.lt.u32.totalorder %s437_s13, %s607_s0 }
  0x18   :  { %p443_p10 = pnand %p441_p9, %p438_p8 }
  0x1a   :  { %446 = shalt.err (!%p443_p10)
}
  0x1b   :  { %s447_s1 = scalar_lea.vmem %s20_s8, 128  ;;  %p452_p12 = scmp.lt.s32.totalorder %s20_s8, %s20_s8 }
  0x1c   :  { %p448_p11 = scmp.ne.s32.totalorder %s20_s8, %s447_s1  ;;  %p453_p13 = scmp.lt.s32.totalorder %s447_s1, %s447_s1 }
  0x1e   :  { %p454_p0 = por %p453_p13, %p452_p12 }
  0x20   :  { %p455_p1 = pnand %p454_p0, %p448_p11 }
  0x22   :  { %458 = shalt.err (!%p455_p1)
}
  0x23   :  { %22 = dma.hbm_to_vmem [thread:$0]  %s607_s0, 128, %s20_s8, [#allocation3]  }
  0x24   :  { %s459_s22 = scalar_lea.hbm %s610_s3, 1024 }
  0x25   :  { %p460_p2 = scmp.ne.s32.totalorder %s610_s3, %s459_s22  ;;  %p463_p3 = scmp.lt.u32.totalorder %s459_s22, %s610_s3 }
  0x27   :  { %p465_p4 = pnand %p463_p3, %p460_p2 }
  0x29   :  { %468 = shalt.err (!%p465_p4)
}
  0x2a   :  { %s469_s27 = scalar_lea.vmem %s43_s10, 1024  ;;  %p474_p6 = scmp.lt.s32.totalorder %s43_s10, %s43_s10 }
  0x2b   :  { %p470_p5 = scmp.ne.s32.totalorder %s43_s10, %s469_s27  ;;  %p475_p7 = scmp.lt.s32.totalorder %s469_s27, %s469_s27 }
  0x2d   :  { %p476_p8 = por %p475_p7, %p474_p6 }
  0x2f   :  { %p477_p9 = pnand %p476_p8, %p470_p5 }
  0x31   :  { %480 = shalt.err (!%p477_p9)
}
  0x32   :  { %48 = dma.hbm_to_vmem [thread:$0]  %s610_s3, 1024, %s43_s10, [#allocation6], %s510_s28, %s510_s28, %s511_s29  }
  0x33   :  { %503 = dma.done.wait [#allocation3], 128  }
  0x34   :  { %504 = vsyncadd [#allocation3], 4294967168 }
  0x35   :  { %505 = dma.done.wait [#allocation6], 2048  }
  0x36   :  { %506 = vsyncadd [#allocation6], 4294965248  ;;  %v514_v0 = vmov 0.0   ;;  %vm515_vm0 = vmmov 0   ;;  %v395_v1 = vld [vmem:[#allocation5] sm:$0xff]   ;;  %v396_v2 = vld [vmem:[#allocation5 + $0x8] sm:$0xff]  }
  0x37   :  { %347 = vmatprep.subr.bf16.mxu0 %v514_v0  ;;  %363 = vmatprep.mubr.msk.bf16.mxu0 %vm515_vm0, %v514_v0  ;;  %v397_v3 = vld [vmem:[#allocation5 + $0x10] sm:$0xff]   ;;  %v403_v4 = vld [vmem:[#allocation7] sm:$0xff]   ;;  %v398_v5 = vld [vmem:[#allocation5 + $0x18] sm:$0xff]  }
  0x38   :  { %367 = vmatprep.subr.bf16.mxu1 %v514_v0  ;;  %383 = vmatprep.mubr.msk.bf16.mxu1 %vm515_vm0, %v514_v0  ;;  %v404_v6 = vld [vmem:[#allocation7 + $0x8] sm:$0xff]   ;;  %v399_v7 = vld [vmem:[#allocation5 + $0x20] sm:$0xff]   ;;  %v405_v8 = vld [vmem:[#allocation7 + $0x10] sm:$0xff]  }
  0x39   :  { %348 = vmatpush3.bf16.msra.mxu0 %v395_v1  ;;  %368 = vmatpush3.bf16.msra.mxu1 %v403_v4  ;;  %v400_v9 = vld [vmem:[#allocation5 + $0x28] sm:$0xff]   ;;  %v406_v10 = vld [vmem:[#allocation7 + $0x18] sm:$0xff]   ;;  %v401_v11 = vld [vmem:[#allocation5 + $0x30] sm:$0xff]  }
  0x3a   :  { %349 = vmatprep.subr.bf16.mxu0 %v514_v0  ;;  %369 = vmatprep.subr.bf16.mxu1 %v514_v0  ;;  %v407_v12 = vld [vmem:[#allocation7 + $0x20] sm:$0xff]   ;;  %v402_v13 = vld [vmem:[#allocation5 + $0x38] sm:$0xff]   ;;  %v408_v15 = vld [vmem:[#allocation7 + $0x28] sm:$0xff]  }
  0x3b   :  { %v61_v14 = vld [vmem:[#allocation2] sm:$0xff]  ;;  %v409_v17 = vld [vmem:[#allocation7 + $0x30] sm:$0xff]  }
  0x3c   :  { %v62_v16 = vpack.c.bf16 %v61_v14, %v61_v14  ;;  %v410_v18 = vld [vmem:[#allocation7 + $0x38] sm:$0xff]  }
  0x3d   :  { %350 = vmatpush3.bf16.msra.mxu0 %v396_v2  ;;  %370 = vmatpush3.bf16.msra.mxu1 %v404_v6  ;;  %v310_v19 = vld [vmem:[%s609_s2] ss:$0 sm:$0xff]  ;;  %s516_s2 = smov [#allocation8]  }
  0x3e   :  { %351 = vmatprep.subr.bf16.mxu0 %v514_v0  ;;  %371 = vmatprep.subr.bf16.mxu1 %v514_v0  ;;  %v319_v27 = vld [vmem:[%s611_s4] ss:$0 sm:$0xff]  ;;  %s300_s7 = sshll.u32 %s516_s2, 4  ;;  %s301_s7 = int_to_ptr.vmem [resolvable:$true] %s300_s7 }
  0x3f   :  { %s481_s8 = scalar_lea.vmem %s301_s7, 128  ;;  %p486_p11 = scmp.lt.s32.totalorder %s301_s7, %s301_s7 }
  0x40   :  { %p482_p10 = scmp.ne.s32.totalorder %s301_s7, %s481_s8  ;;  %p487_p12 = scmp.lt.s32.totalorder %s481_s8, %s481_s8 }
  0x41   :  { %352 = vmatpush3.bf16.msra.mxu0 %v397_v3  ;;  %372 = vmatpush3.bf16.msra.mxu1 %v405_v8 }
  0x42   :  { %353 = vmatprep.subr.bf16.mxu0 %v514_v0  ;;  %373 = vmatprep.subr.bf16.mxu1 %v514_v0  ;;  %p488_p13 = por %p487_p12, %p486_p11 }
  0x44   :  { %p489_p0 = pnand %p488_p13, %p482_p10 }
  0x45   :  { %354 = vmatpush3.bf16.msra.mxu0 %v398_v5  ;;  %374 = vmatpush3.bf16.msra.mxu1 %v406_v10 }
  0x46   :  { %355 = vmatprep.subr.bf16.mxu0 %v514_v0  ;;  %375 = vmatprep.subr.bf16.mxu1 %v514_v0 }
  0x49   :  { %356 = vmatpush3.bf16.msra.mxu0 %v399_v7  ;;  %376 = vmatpush3.bf16.msra.mxu1 %v407_v12 }
  0x4a   :  { %357 = vmatprep.subr.bf16.mxu0 %v514_v0  ;;  %377 = vmatprep.subr.bf16.mxu1 %v514_v0 }
  0x4d   :  { %358 = vmatpush3.bf16.msra.mxu0 %v400_v9  ;;  %378 = vmatpush3.bf16.msra.mxu1 %v408_v15 }
  0x4e   :  { %359 = vmatprep.subr.bf16.mxu0 %v514_v0  ;;  %379 = vmatprep.subr.bf16.mxu1 %v514_v0 }
  0x51   :  { %360 = vmatpush3.bf16.msra.mxu0 %v401_v11  ;;  %380 = vmatpush3.bf16.msra.mxu1 %v409_v17 }
  0x52   :  { %361 = vmatprep.subr.bf16.mxu0 %v514_v0  ;;  %381 = vmatprep.subr.bf16.mxu1 %v514_v0 }
  0x55   :  { %362 = vmatpush3.bf16.msra.mxu0 %v402_v13  ;;  %382 = vmatpush3.bf16.msra.mxu1 %v410_v18 }
  0x58   :  { %364 = vmatmul.mubr.bf16.vlgmr.msra.gmra.mrb[0].mxu0 %v62_v16 }
 0x12b   :  { %v168_v20 = vpop.f32.mrb[0].mxu0 }
 0x12c   :  { %v169_v21 = vadd.f32 %v310_v19, %v168_v20  ;;  %v365_v22 = vpop.f32.mrb[1].mxu0 }
 0x12d   :  { %v171_v23 = vpop.f32.mrb[2].mxu0 }
 0x12e   :  { %v174_v24 = vmax.f32 %v169_v21, 0.0  ;;  %v366_v25 = vpop.f32.mrb[3].mxu0 }
 0x130   :  { %v175_v26 = vpack.c.bf16 %v174_v24, %v174_v24 }
 0x132   :  { %384 = vmatmul.mubr.bf16.vlgmr.msra.gmra.mrb[0].mxu1 %v175_v26 }
 0x205   :  { %v281_v28 = vpop.f32.mrb[0].mxu1 }
 0x206   :  { %v282_v29 = vadd.f32 %v319_v27, %v281_v28  ;;  %v385_v30 = vpop.f32.mrb[1].mxu1 }
 0x207   :  { %v284_v31 = vpop.f32.mrb[2].mxu1 }
 0x208   :  { %v328_v32 = vmul.f32 -1.442695, %v282_v29  ;;  %v386_v33 = vpop.f32.mrb[3].mxu1 }
 0x20a   :  { %411 = vpow2.f32 %v328_v32 }
 0x214   :  { %v412_v34 = vpop.eup %411 }
 0x215   :  { %v290_v35 = vadd.f32 1.0, %v412_v34 }
 0x217   :  { %413 = vrcp.f32 %v290_v35 }
 0x221   :  { %v414_v36 = vpop.eup %413 }
 0x222   :  { %293 = vst [vmem:[#allocation8] sm:$0xff] %v414_v36 }
 0x223   :  { %492 = shalt.err (!%p489_p0)
}
 0x224   :  { %s493_s10 = scalar_lea.hbm %s612_s5, 128 }
 0x225   :  { %p494_p1 = scmp.ne.s32.totalorder %s612_s5, %s493_s10  ;;  %p497_p2 = scmp.lt.u32.totalorder %s493_s10, %s612_s5 }
 0x227   :  { %p499_p3 = pnand %p497_p2, %p494_p1 }
 0x229   :  { %502 = shalt.err (!%p499_p3)
}
 0x22a   :  { %303 = dma.vmem_to_hbm [thread:$0]  %s301_s7, 128, %s612_s5, [#allocation4]  }
 0x22b   :  { %507 = dma.done.wait [#allocation4], 128  }
 0x22c   :  { %508 = vsyncadd [#allocation4], 4294967168 }
 0x22d   :  { %307 = vsyncpa [#allocation3], 1 }
 0x22e   :  { %308 = vsyncpa [#allocation6], 1 }
 0x22f   :  { %309 = vsyncpa [#allocation4], 1 }

</bundles_post_ra>
